<compile_context>
chip_gen: v7x
topology: tpu7x:2x2x1
jax: 0.10.0
libtpu: 0.0.40
codegen_flags: <defaults>
</compile_context>

<pallas_src>
import jax
import jax.numpy as jnp
from jax.experimental import pallas as pl
from jax.experimental.pallas import tpu as pltpu

IN_FEATURES = 48 * 7 * 7   # 2352 (deliberately unpadded; padding adds HBM reads for no gain)
HIDDEN = 100
NUM_CLASSES = 10

HIDDEN_PAD = 128           # 100 -> 128: lane-dense hidden activations, full MXU columns
CLASS_PAD = 128            # 10  -> 128: lane-dense fc3 matmul; sliced to 10 before softmax
MAX_BATCH_TILE = 1024      # upper bound only; actual tile derived from batch below
# TODO(synk): on v5e/v6e (128 MiB VMEM, single TC) MAX_BATCH_TILE can be raised to
# 2048-4096 with vmem_limit_bytes ~64-96 MiB for a further ~5-10%; kept at 1024 so the
# same tiling also fits v7x's 64 MiB/TC with double-buffered f32 x tiles.
# TODO(synk): on v7x, if profiling shows exposed x DMA at step boundaries, sweep
# pipeline_mode=pl.Buffered(3) on the x BlockSpec.


def _round_up(n, m):
    return ((n + m - 1) // m) * m


def _mlp_kernel(x_ref, w1_ref, b1_ref, w2_ref, b2_ref, w3_ref, b3_ref, out_ref):
    """One batch tile: fc1 -> relu -> fc2 -> relu -> fc3 -> softmax over 10 classes."""
    # x arrives as f32 straight from HBM (single pass); cast to bf16 in VMEM just
    # before the MXU dot. f32 accumulation + f32 biases throughout.
    x = x_ref[...].astype(jnp.bfloat16)                               # (TB, 2352)

    h1 = jnp.dot(x, w1_ref[...], preferred_element_type=jnp.float32) + b1_ref[...]
    h1 = jnp.maximum(h1, 0.0).astype(jnp.bfloat16)                    # (TB, 128)

    h2 = jnp.dot(h1, w2_ref[...], preferred_element_type=jnp.float32) + b2_ref[...]
    h2 = jnp.maximum(h2, 0.0).astype(jnp.bfloat16)                    # (TB, 128)

    logits = jnp.dot(h2, w3_ref[...], preferred_element_type=jnp.float32) + b3_ref[...]
    logits = logits[:, :NUM_CLASSES]                                  # drop padded class cols
    m = jnp.max(logits, axis=-1, keepdims=True)
    e = jnp.exp(logits - m)
    out_ref[...] = e * pl.reciprocal(jnp.sum(e, axis=-1, keepdims=True), approx=False)


def prepare_params(params):
    """One-time padding to lane-dense shapes + bf16 cast of weights (biases stay f32)."""
    def pad2(a, rows, cols):
        return jnp.pad(a, ((0, rows - a.shape[0]), (0, cols - a.shape[1])))
    return {
        "w1": pad2(params["w1"], IN_FEATURES, HIDDEN_PAD).astype(jnp.bfloat16),
        "b1": pad2(params["b1"], 1, HIDDEN_PAD).astype(jnp.float32),
        "w2": pad2(params["w2"], HIDDEN_PAD, HIDDEN_PAD).astype(jnp.bfloat16),
        "b2": pad2(params["b2"], 1, HIDDEN_PAD).astype(jnp.float32),
        "w3": pad2(params["w3"], HIDDEN_PAD, CLASS_PAD).astype(jnp.bfloat16),
        "b3": pad2(params["b3"], 1, CLASS_PAD).astype(jnp.float32),
    }


def mnist_classifier_forward(x, kparams):
    """x: (B, 48, 7, 7) NCHW f32; kparams: output of prepare_params. Returns (B, 10) probs."""
    b = x.shape[0]
    x2d = x.reshape(b, IN_FEATURES)   # stays f32: no extra wrapper-side dtype pass over x

    # >=2 grid steps whenever possible (feeds both v7x TCs), rounded to the sublane
    # granule, capped by MAX_BATCH_TILE.
    tb = min(MAX_BATCH_TILE, max(8, _round_up(pl.cdiv(b, 2), 8)))
    grid = (pl.cdiv(b, tb),)

    const = lambda i: (0, 0)          # same block every step -> resident in VMEM
    resident = pl.Buffered(1)         # single VMEM copy for the once-DMA'd params

    out = pl.pallas_call(
        _mlp_kernel,
        out_shape=jax.ShapeDtypeStruct((b, NUM_CLASSES), jnp.float32),
        grid=grid,
        in_specs=[
            pl.BlockSpec((tb, IN_FEATURES), lambda i: (i, 0)),                     # x stream
            pl.BlockSpec((IN_FEATURES, HIDDEN_PAD), const, pipeline_mode=resident),  # w1
            pl.BlockSpec((1, HIDDEN_PAD), const, pipeline_mode=resident),            # b1
            pl.BlockSpec((HIDDEN_PAD, HIDDEN_PAD), const, pipeline_mode=resident),   # w2
            pl.BlockSpec((1, HIDDEN_PAD), const, pipeline_mode=resident),            # b2
            pl.BlockSpec((HIDDEN_PAD, CLASS_PAD), const, pipeline_mode=resident),    # w3
            pl.BlockSpec((1, CLASS_PAD), const, pipeline_mode=resident),             # b3
        ],
        out_specs=pl.BlockSpec((tb, NUM_CLASSES), lambda i: (i, 0)),
        compiler_params=pltpu.CompilerParams(
            dimension_semantics=("parallel",),   # shard batch tiles across TCs (v7x)
            vmem_limit_bytes=48 << 20,           # explicit budget; fits v7x 64 MiB/TC
        ),
    )(x2d, kparams["w1"], kparams["b1"], kparams["w2"], kparams["b2"],
      kparams["w3"], kparams["b3"])
    return out


def init_params(key):
    """Deterministic synthetic parameters (PyTorch nn.Linear init, transposed layout)."""
    k1, k2, k3, k4, k5, k6 = jax.random.split(key, 6)

    def uinit(k, shape, fan_in):
        bound = 1.0 / jnp.sqrt(fan_in)
        return jax.random.uniform(k, shape, jnp.float32, -bound, bound)

    return {
        "w1": uinit(k1, (IN_FEATURES, HIDDEN), IN_FEATURES),
        "b1": uinit(k2, (1, HIDDEN), IN_FEATURES),
        "w2": uinit(k3, (HIDDEN, HIDDEN), HIDDEN),
        "b2": uinit(k4, (1, HIDDEN), HIDDEN),
        "w3": uinit(k5, (HIDDEN, NUM_CLASSES), HIDDEN),
        "b3": uinit(k6, (1, NUM_CLASSES), HIDDEN),
    }


def _reference_forward(x, params):
    """Pure-JAX reference mirroring the kernel's bf16 operand handling."""
    b = x.shape[0]
    f32 = jnp.float32
    h = x.reshape(b, IN_FEATURES).astype(jnp.bfloat16).astype(f32)
    w1 = params["w1"].astype(jnp.bfloat16).astype(f32)
    w2 = params["w2"].astype(jnp.bfloat16).astype(f32)
    w3 = params["w3"].astype(jnp.bfloat16).astype(f32)
    h = jnp.maximum(h @ w1 + params["b1"], 0.0).astype(jnp.bfloat16).astype(f32)
    h = jnp.maximum(h @ w2 + params["b2"], 0.0).astype(jnp.bfloat16).astype(f32)
    logits = h @ w3 + params["b3"]
    return jax.nn.softmax(logits, axis=-1)


if __name__ == "__main__":
    key = jax.random.PRNGKey(0)
    kx, kp = jax.random.split(key)

    batch = 2
    x = jax.random.normal(kx, (batch, 48, 7, 7), dtype=jnp.float32)  # NCHW input
    params = init_params(kp)
    kparams = prepare_params(params)

    out = mnist_classifier_forward(x, kparams)
    out = jax.block_until_ready(out)

    ref = _reference_forward(x, params)
    assert out.shape == (batch, NUM_CLASSES)
    assert jnp.allclose(out, ref, atol=2e-3, rtol=2e-3), float(jnp.max(jnp.abs(out - ref)))
    assert jnp.allclose(jnp.sum(out, axis=-1), 1.0, atol=1e-4)

    print("KERNEL_OK")
</pallas_src>

<mosaic_0001>
module attributes {stable_mosaic.version = 11 : i64} {
  func.func @_mlp_kernel(%arg0: i32, %arg1: memref<8x2352xf32, #tpu.memory_space<vmem>>, %arg2: memref<2352x128xbf16, #tpu.memory_space<vmem>>, %arg3: memref<1x128xf32, #tpu.memory_space<vmem>>, %arg4: memref<128x128xbf16, #tpu.memory_space<vmem>>, %arg5: memref<1x128xf32, #tpu.memory_space<vmem>>, %arg6: memref<128x128xbf16, #tpu.memory_space<vmem>>, %arg7: memref<1x128xf32, #tpu.memory_space<vmem>>, %arg8: memref<8x10xf32, #tpu.memory_space<vmem>>) attributes {dimension_semantics = [#tpu.dimension_semantics<parallel>], iteration_bounds = array<i64: 1>, scalar_prefetch = 0 : i64, scratch_operands = 0 : i64, tpu.core_type = #tpu.core_type<tc>, window_params = [{transform_indices = @transform_0, window_bounds = array<i64: 8, 2352>}, {pipeline_mode = #tpu.pipeline_mode<synchronous>, transform_indices = @transform_1, window_bounds = array<i64: 2352, 128>}, {pipeline_mode = #tpu.pipeline_mode<synchronous>, transform_indices = @transform_2, window_bounds = array<i64: 1, 128>}, {pipeline_mode = #tpu.pipeline_mode<synchronous>, transform_indices = @transform_3, window_bounds = array<i64: 128, 128>}, {pipeline_mode = #tpu.pipeline_mode<synchronous>, transform_indices = @transform_4, window_bounds = array<i64: 1, 128>}, {pipeline_mode = #tpu.pipeline_mode<synchronous>, transform_indices = @transform_5, window_bounds = array<i64: 128, 128>}, {pipeline_mode = #tpu.pipeline_mode<synchronous>, transform_indices = @transform_6, window_bounds = array<i64: 1, 128>}, {transform_indices = @transform_7, window_bounds = array<i64: 8, 10>}]} {
    %c0 = arith.constant 0 : index
    %c0_0 = arith.constant 0 : index
    %0 = vector.load %arg1[%c0, %c0_0] : memref<8x2352xf32, #tpu.memory_space<vmem>>, vector<8x2352xf32>
    %1 = arith.truncf %0 : vector<8x2352xf32> to vector<8x2352xbf16>
    %c0_1 = arith.constant 0 : index
    %c0_2 = arith.constant 0 : index
    %2 = vector.load %arg2[%c0_1, %c0_2] : memref<2352x128xbf16, #tpu.memory_space<vmem>>, vector<2352x128xbf16>
    %cst = arith.constant dense<0.000000e+00> : vector<8x128xf32>
    %3 = tpu.matmul %1, %2, %cst {dimension_numbers = #tpu.dot_dimension_numbers<[1], [0], [0], [1], [0, 0, 1, 1], [], []>} : vector<8x2352xbf16>, vector<2352x128xbf16>, vector<8x128xf32> -> vector<8x128xf32>
    %c0_3 = arith.constant 0 : index
    %c0_4 = arith.constant 0 : index
    %4 = vector.load %arg3[%c0_3, %c0_4] : memref<1x128xf32, #tpu.memory_space<vmem>>, vector<1x128xf32>
    %5 = vector.broadcast %4 : vector<1x128xf32> to vector<8x128xf32>
    %6 = arith.addf %3, %5 : vector<8x128xf32>
    %cst_5 = arith.constant 0.000000e+00 : f32
    %7 = vector.broadcast %cst_5 : f32 to vector<8x128xf32>
    %8 = arith.maximumf %6, %7 : vector<8x128xf32>
    %9 = arith.truncf %8 : vector<8x128xf32> to vector<8x128xbf16>
    %c0_6 = arith.constant 0 : index
    %c0_7 = arith.constant 0 : index
    %10 = vector.load %arg4[%c0_6, %c0_7] : memref<128x128xbf16, #tpu.memory_space<vmem>>, vector<128x128xbf16>
    %cst_8 = arith.constant dense<0.000000e+00> : vector<8x128xf32>
    %11 = tpu.matmul %9, %10, %cst_8 {dimension_numbers = #tpu.dot_dimension_numbers<[1], [0], [0], [1], [0, 0, 1, 1], [], []>} : vector<8x128xbf16>, vector<128x128xbf16>, vector<8x128xf32> -> vector<8x128xf32>
    %c0_9 = arith.constant 0 : index
    %c0_10 = arith.constant 0 : index
    %12 = vector.load %arg5[%c0_9, %c0_10] : memref<1x128xf32, #tpu.memory_space<vmem>>, vector<1x128xf32>
    %13 = vector.broadcast %12 : vector<1x128xf32> to vector<8x128xf32>
    %14 = arith.addf %11, %13 : vector<8x128xf32>
    %cst_11 = arith.constant 0.000000e+00 : f32
    %15 = vector.broadcast %cst_11 : f32 to vector<8x128xf32>
    %16 = arith.maximumf %14, %15 : vector<8x128xf32>
    %17 = arith.truncf %16 : vector<8x128xf32> to vector<8x128xbf16>
    %c0_12 = arith.constant 0 : index
    %c0_13 = arith.constant 0 : index
    %18 = vector.load %arg6[%c0_12, %c0_13] : memref<128x128xbf16, #tpu.memory_space<vmem>>, vector<128x128xbf16>
    %cst_14 = arith.constant dense<0.000000e+00> : vector<8x128xf32>
    %19 = tpu.matmul %17, %18, %cst_14 {dimension_numbers = #tpu.dot_dimension_numbers<[1], [0], [0], [1], [0, 0, 1, 1], [], []>} : vector<8x128xbf16>, vector<128x128xbf16>, vector<8x128xf32> -> vector<8x128xf32>
    %c0_15 = arith.constant 0 : index
    %c0_16 = arith.constant 0 : index
    %20 = vector.load %arg7[%c0_15, %c0_16] : memref<1x128xf32, #tpu.memory_space<vmem>>, vector<1x128xf32>
    %21 = vector.broadcast %20 : vector<1x128xf32> to vector<8x128xf32>
    %22 = arith.addf %19, %21 : vector<8x128xf32>
    %23 = vector.extract_strided_slice %22 {offsets = [0, 0], sizes = [8, 10], strides = [1, 1]} : vector<8x128xf32> to vector<8x10xf32>
    %cst_17 = arith.constant dense<0xFF800000> : vector<8xf32>
    %24 = vector.multi_reduction <maximumf>, %23, %cst_17 [1] : vector<8x10xf32> to vector<8xf32>
    %25 = vector.shape_cast %24 : vector<8xf32> to vector<8x1xf32>
    %26 = vector.broadcast %25 : vector<8x1xf32> to vector<8x10xf32>
    %27 = arith.subf %23, %26 : vector<8x10xf32>
    %28 = math.exp %27 : vector<8x10xf32>
    %cst_18 = arith.constant dense<0.000000e+00> : vector<8xf32>
    %29 = vector.multi_reduction <add>, %28, %cst_18 [1] : vector<8x10xf32> to vector<8xf32>
    %30 = vector.shape_cast %29 : vector<8xf32> to vector<8x1xf32>
    %31 = tpu.reciprocal %30 : vector<8x1xf32> -> vector<8x1xf32>
    %32 = vector.broadcast %31 : vector<8x1xf32> to vector<8x10xf32>
    %33 = arith.mulf %28, %32 : vector<8x10xf32>
    %c0_19 = arith.constant 0 : index
    %c0_20 = arith.constant 0 : index
    %34 = vector.load %arg8[%c0_19, %c0_20] : memref<8x10xf32, #tpu.memory_space<vmem>>, vector<8x10xf32>
    tpu.vector_store %arg8[%c0_19, %c0_20], %33 {strides = array<i32>} : memref<8x10xf32, #tpu.memory_space<vmem>>, vector<8x10xf32>,
    return
  }
  func.func @transform_0(%arg0: i32) -> (i32, i32) {
    %c0_i32 = arith.constant 0 : i32
    %c0_i32_0 = arith.constant 0 : i32
    return %arg0, %c0_i32 : i32, i32
  }
  func.func @transform_1(%arg0: i32) -> (i32, i32) {
    %c0_i32 = arith.constant 0 : i32
    %c0_i32_0 = arith.constant 0 : i32
    %c0_i32_1 = arith.constant 0 : i32
    return %c0_i32, %c0_i32_0 : i32, i32
  }
  func.func @transform_2(%arg0: i32) -> (i32, i32) {
    %c0_i32 = arith.constant 0 : i32
    %c0_i32_0 = arith.constant 0 : i32
    %c0_i32_1 = arith.constant 0 : i32
    return %c0_i32, %c0_i32_0 : i32, i32
  }
  func.func @transform_3(%arg0: i32) -> (i32, i32) {
    %c0_i32 = arith.constant 0 : i32
    %c0_i32_0 = arith.constant 0 : i32
    %c0_i32_1 = arith.constant 0 : i32
    return %c0_i32, %c0_i32_0 : i32, i32
  }
  func.func @transform_4(%arg0: i32) -> (i32, i32) {
    %c0_i32 = arith.constant 0 : i32
    %c0_i32_0 = arith.constant 0 : i32
    %c0_i32_1 = arith.constant 0 : i32
    return %c0_i32, %c0_i32_0 : i32, i32
  }
  func.func @transform_5(%arg0: i32) -> (i32, i32) {
    %c0_i32 = arith.constant 0 : i32
    %c0_i32_0 = arith.constant 0 : i32
    %c0_i32_1 = arith.constant 0 : i32
    return %c0_i32, %c0_i32_0 : i32, i32
  }
  func.func @transform_6(%arg0: i32) -> (i32, i32) {
    %c0_i32 = arith.constant 0 : i32
    %c0_i32_0 = arith.constant 0 : i32
    %c0_i32_1 = arith.constant 0 : i32
    return %c0_i32, %c0_i32_0 : i32, i32
  }
  func.func @transform_7(%arg0: i32) -> (i32, i32) {
    %c0_i32 = arith.constant 0 : i32
    %c0_i32_0 = arith.constant 0 : i32
    return %arg0, %c0_i32 : i32, i32
  }
}

</mosaic_0001>

<bundles_post_ra>
// kernel: tpu_custom_call.1
= control target key start
LH: loop header
LB: loop body
LE: loop exit
PB: predicated region body
PF: predicated region fallthrough
CT: control target
= control target key end

     0   :  { %12 = vsyncpa [#allocation3], 0  ;;  %s3141_s0 = inlined_call_operand.hbm [shape: f32[2,2352], index: 0, kind: input, shape index: {}]   ;;  %s3142_s1 = inlined_call_operand.hbm [shape: bf16[2352,128], index: 1, kind: input, shape index: {}]   ;;  %s3143_s2 = inlined_call_operand.vmem [shape: f32[1,128], index: 2, kind: input, shape index: {}]   ;;  %s3144_s3 = inlined_call_operand.hbm [shape: bf16[128,128], index: 3, kind: input, shape index: {}]   ;;  %s3145_s4 = inlined_call_operand.vmem [shape: f32[1,128], index: 4, kind: input, shape index: {}]   ;;  %s3146_s5 = inlined_call_operand.hbm [shape: bf16[128,128], index: 5, kind: input, shape index: {}]   ;;  %s3147_s6 = inlined_call_operand.vmem [shape: f32[1,128], index: 6, kind: input, shape index: {}]   ;;  %s3148_s7 = inlined_call_operand.hbm [shape: f32[2,10], index: 7, kind: output, shape index: {}]  }
   0x1   :  { %13 = vsyncpa [#allocation6], 0 }
   0x2   :  { %14 = vsyncpa [#allocation9], 0 }
   0x3   :  { %15 = vsyncpa [#allocation4], 0 }
   0x4   :  { %20 = vsyncadd [#allocation3], 1824  ;;  %s2951_s24 = smov [#allocation5]   ;;  %s2833_s28 = scalar_lea.hbm %s3142_s1, 18816 }
   0x5   :  { %s33_s25 = sshll.u32 %s2951_s24, 4  ;;  %p2834_p0 = scmp.ne.s32.totalorder %s3142_s1, %s2833_s28  ;;  %s34_s25 = int_to_ptr.vmem [resolvable:$true] %s33_s25 }
   0x6   :  { %p2837_p1 = scmp.lt.u32.totalorder %s2833_s28, %s3142_s1 }
   0x8   :  { %p2839_p2 = pnand %p2837_p1, %p2834_p0 }
   0xa   :  { %2842 = shalt.err (!%p2839_p2)
}
   0xb   :  { %s2843_s10 = scalar_lea.vmem %s34_s25, 18816  ;;  %p2848_p4 = scmp.lt.s32.totalorder %s34_s25, %s34_s25 }
   0xc   :  { %p2844_p3 = scmp.ne.s32.totalorder %s34_s25, %s2843_s10  ;;  %p2849_p5 = scmp.lt.s32.totalorder %s2843_s10, %s2843_s10 }
   0xe   :  { %p2850_p6 = por %p2849_p5, %p2848_p4 }
  0x10   :  { %p2851_p7 = pnand %p2850_p6, %p2844_p3 }
  0x12   :  { %2854 = shalt.err (!%p2851_p7)
}
  0x13   :  { %s2952_s11 = smov 64   ;;  %s2953_s12 = smov 4  }
  0x14   :  { %39 = dma.hbm_to_vmem [thread:$0]  %s3142_s1, 18816, %s34_s25, [#allocation6], %s2952_s11, %s2952_s11, %s2953_s12  }
  0x15   :  { %s2954_s15 = smov [#allocation2]   ;;  %s2855_s19 = scalar_lea.hbm %s3141_s0, 608 }
  0x16   :  { %s21_s16 = sshll.u32 %s2954_s15, 4  ;;  %p2856_p8 = scmp.ne.s32.totalorder %s3141_s0, %s2855_s19  ;;  %s22_s16 = int_to_ptr.vmem [resolvable:$true] %s21_s16 }
  0x17   :  { %p2859_p9 = scmp.lt.u32.totalorder %s2855_s19, %s3141_s0 }
  0x19   :  { %p2861_p10 = pnand %p2859_p9, %p2856_p8 }
  0x1b   :  { %2864 = shalt.err (!%p2861_p10)
}
  0x1c   :  { %s2865_s24 = scalar_lea.vmem %s22_s16, 608  ;;  %s2869_s1 = scalar_lea.vmem %s22_s16, 2432 }
  0x1d   :  { %p2866_p11 = scmp.ne.s32.totalorder %s22_s16, %s2865_s24  ;;  %p2870_p12 = scmp.lt.s32.totalorder %s22_s16, %s22_s16 }
  0x1e   :  { %p2871_p13 = scmp.lt.s32.totalorder %s2869_s1, %s2865_s24 }
  0x20   :  { %p2872_p0 = por %p2871_p13, %p2870_p12 }
  0x22   :  { %p2873_p1 = pnand %p2872_p0, %p2866_p11 }
  0x24   :  { %2876 = shalt.err (!%p2873_p1)
}
  0x25   :  { %s2955_s25 = smov 608   ;;  %s2956_s26 = smov 38  }
  0x26   :  { %27 = dma.hbm_to_vmem [thread:$0]  %s3141_s0, 608, %s22_s16, [#allocation3], %s2955_s25, %s2955_s25, %s2956_s26  }
  0x27   :  { %s2957_s29 = smov [#allocation7]   ;;  %s2958_s8 = smov [#allocation8]  }
  0x28   :  { %s47_s30 = sshll.u32 %s2957_s29, 4  ;;  %s61_s9 = sshll.u32 %s2958_s8, 4  ;;  %s48_s30 = int_to_ptr.vmem [resolvable:$true] %s47_s30  ;;  %s3032_s9 = int_to_ptr.vmem [resolvable:$true] %s61_s9 }
  0x29   :  { %s2877_s14 = scalar_lea.hbm %s3144_s3, 1024 }
  0x2a   :  { %p2878_p2 = scmp.ne.s32.totalorder %s3144_s3, %s2877_s14  ;;  %p2881_p3 = scmp.lt.u32.totalorder %s2877_s14, %s3144_s3 }
  0x2c   :  { %p2883_p4 = pnand %p2881_p3, %p2878_p2 }
  0x2e   :  { %2886 = shalt.err (!%p2883_p4)
}
  0x2f   :  { %s2887_s0 = scalar_lea.vmem %s48_s30, 1024  ;;  %p2892_p6 = scmp.lt.s32.totalorder %s48_s30, %s48_s30 }
  0x30   :  { %p2888_p5 = scmp.ne.s32.totalorder %s48_s30, %s2887_s0  ;;  %p2893_p7 = scmp.lt.s32.totalorder %s2887_s0, %s2887_s0 }
  0x32   :  { %p2894_p8 = por %p2893_p7, %p2892_p6 }
  0x34   :  { %p2895_p9 = pnand %p2894_p8, %p2888_p5 }
  0x36   :  { %2898 = shalt.err (!%p2895_p9)
}
  0x37   :  { %53 = dma.hbm_to_vmem [thread:$0]  %s3144_s3, 1024, %s48_s30, [#allocation6], %s2952_s11, %s2952_s11, %s2953_s12  }
  0x38   :  { %s2899_s23 = scalar_lea.hbm %s3146_s5, 1024 }
  0x39   :  { %p2900_p10 = scmp.ne.s32.totalorder %s3146_s5, %s2899_s23  ;;  %p2903_p11 = scmp.lt.u32.totalorder %s2899_s23, %s3146_s5 }
  0x3b   :  { %p2905_p12 = pnand %p2903_p11, %p2900_p10 }
  0x3d   :  { %2908 = shalt.err (!%p2905_p12)
}
  0x3e   :  { %s2909_s27 = scalar_lea.vmem %s3032_s9, 1024  ;;  %p2914_p0 = scmp.lt.s32.totalorder %s3032_s9, %s3032_s9 }
  0x3f   :  { %p2910_p13 = scmp.ne.s32.totalorder %s3032_s9, %s2909_s27  ;;  %p2915_p1 = scmp.lt.s32.totalorder %s2909_s27, %s2909_s27 }
  0x41   :  { %p2916_p2 = por %p2915_p1, %p2914_p0 }
  0x43   :  { %p2917_p3 = pnand %p2916_p2, %p2910_p13 }
  0x45   :  { %2920 = shalt.err (!%p2917_p3)
}
  0x46   :  { %67 = dma.hbm_to_vmem [thread:$0]  %s3146_s5, 1024, %s3032_s9, [#allocation9], %s2952_s11, %s2952_s11, %s2953_s12  }
  0x47   :  { %2943 = dma.done.wait [#allocation3], 2432  }
  0x48   :  { %2944 = vsyncadd [#allocation3], 4294964864 }
  0x49   :  { %2945 = dma.done.wait [#allocation6], 19840  }
  0x4a   :  { %2946 = vsyncadd [#allocation6], 4294947456 }
  0x4b   :  { %2947 = dma.done.wait [#allocation9], 1024  }
  0x4c   :  { %2948 = vsyncadd [#allocation9], 4294966272  ;;  %v2636_v0 = vld [vmem:[#allocation5 + $0x40] sm:$0xff]   ;;  %v2640_v4 = vld [vmem:[#allocation5 + $0x48] sm:$0xff]   ;;  %v2959_v23 = vmov 1983009808   ;;  %v130_v25 = vlaneseq }
  0x4d   :  { %v2637_v1 = vld [vmem:[#allocation5] sm:$0xff]   ;;  %2352 = vmatprep.subr.bf16.mxu0 %v2636_v0  ;;  %v2641_v5 = vld [vmem:[#allocation5 + $0x8] sm:$0xff]   ;;  %v2644_v8 = vld [vmem:[#allocation5 + $0x50] sm:$0xff]   ;;  %v128_v24 = vunpack.c.l.s4 %v2959_v23  ;;  %vm2961_vm0 = vmmov 0   ;;  %vm1523_vm1 = vcmask 392192   ;;  %vm2153_vm2 = vcmask 80896  }
  0x4e   :  { %v2638_v2 = vld [vmem:[#allocation5 + $0xc0] sm:$0xff]   ;;  %2353 = vmatpush3.bf16.msra.mxu0 %v2637_v1  ;;  %v2642_v6 = vld [vmem:[#allocation5 + $0xc8] sm:$0xff]   ;;  %v2645_v9 = vld [vmem:[#allocation5 + $0x10] sm:$0xff]   ;;  %v131_v31 = vshrl.u32 %v130_v25, 7 }
  0x4f   :  { %v2639_v3 = vld [vmem:[#allocation5 + $0x80] sm:$0xff]   ;;  %2374 = vmatprep.subr.bf16.mxu1 %v2638_v2  ;;  %2354 = vmatprep.subr.bf16.mxu0 %v2640_v4  ;;  %v2643_v7 = vld [vmem:[#allocation5 + $0x88] sm:$0xff]   ;;  %v2646_v10 = vld [vmem:[#allocation5 + $0xd0] sm:$0xff]   ;;  %v129_v30 = vunpack.c.0.s8 %v128_v24 }
  0x50   :  { %2375 = vmatpush3.bf16.msra.mxu1 %v2639_v3  ;;  %v2647_v11 = vld [vmem:[#allocation5 + $0x90] sm:$0xff]   ;;  %v2648_v12 = vld [vmem:[#allocation5 + $0x58] sm:$0xff]   ;;  %v2652_v16 = vld [vmem:[#allocation5 + $0x60] sm:$0xff]  }
  0x51   :  { %2376 = vmatprep.subr.bf16.mxu1 %v2642_v6  ;;  %v2649_v13 = vld [vmem:[#allocation5 + $0x18] sm:$0xff]   ;;  %v2653_v17 = vld [vmem:[#allocation5 + $0x20] sm:$0xff]   ;;  %v2656_v20 = vld [vmem:[#allocation5 + $0x68] sm:$0xff]   ;;  %v3069_v36 = vsub.s32 %v129_v30, %v131_v31 }
  0x52   :  { %2355 = vmatpush3.bf16.msra.mxu0 %v2641_v5  ;;  %v2650_v14 = vld [vmem:[#allocation5 + $0xd8] sm:$0xff]   ;;  %v2654_v18 = vld [vmem:[#allocation5 + $0xe0] sm:$0xff]   ;;  %v2657_v21 = vld [vmem:[#allocation5 + $0x28] sm:$0xff]  }
  0x53   :  { %2356 = vmatprep.subr.bf16.mxu0 %v2644_v8  ;;  %v2651_v15 = vld [vmem:[#allocation5 + $0x98] sm:$0xff]   ;;  %v2655_v19 = vld [vmem:[#allocation5 + $0xa0] sm:$0xff]   ;;  %v2658_v22 = vld [vmem:[#allocation5 + $0xe8] sm:$0xff]  }
  0x54   :  { %2377 = vmatpush3.bf16.msra.mxu1 %v2643_v7  ;;  %v2659_v26 = vld [vmem:[#allocation5 + $0xa8] sm:$0xff]   ;;  %v2660_v27 = vld [vmem:[#allocation5 + $0x70] sm:$0xff]   ;;  %v2664_v33 = vld [vmem:[#allocation5 + $0x78] sm:$0xff]  }
  0x55   :  { %2378 = vmatprep.subr.bf16.mxu1 %v2646_v10  ;;  %v2661_v28 = vld [vmem:[#allocation5 + $0x30] sm:$0xff]   ;;  %v2665_v34 = vld [vmem:[#allocation5 + $0x38] sm:$0xff]   ;;  %v2672_v42 = vld [vmem:[#allocation5 + $0x140] sm:$0xff]  }
  0x56   :  { %2357 = vmatpush3.bf16.msra.mxu0 %v2645_v9  ;;  %v2662_v29 = vld [vmem:[#allocation5 + $0xf0] sm:$0xff]   ;;  %v2666_v35 = vld [vmem:[#allocation5 + $0xf8] sm:$0xff]   ;;  %v2676_v49 = vld [vmem:[#allocation5 + $0x1c0] sm:$0xff]  }
  0x57   :  { %2358 = vmatprep.subr.bf16.mxu0 %v2648_v12  ;;  %v2663_v32 = vld [vmem:[#allocation5 + $0xb0] sm:$0xff]   ;;  %v2671_v39 = vld [vmem:[#allocation5 + $0xb8] sm:$0xff]   ;;  %v2675_v52 = vld [vmem:[#allocation5 + $0x100] sm:$0xff]  }
  0x58   :  { %2379 = vmatpush3.bf16.msra.mxu1 %v2647_v11  ;;  %v2667_v37 = vld [vmem:[#allocation2] ss:$38 sps:$4 sm:$0xff]   ;;  %v2669_v38 = vld [vmem:[#allocation2 + $0x4c] ss:$38 sps:$4 sm:$0xff]   ;;  %v2677_v56 = vld [vmem:[#allocation5 + $0x180] sm:$0xff]  }
  0x59   :  { %2380 = vmatprep.subr.bf16.mxu1 %v2650_v14  ;;  %v133_v40 = vrot.slane %v2667_v37, %v3069_v36  ;;  %v147_v41 = vrot.slane %v2669_v38, %v3069_v36  ;;  %v2673_v43 = vld [vmem:[#allocation2 + $0x4] ss:$38 sps:$4 sm:$0xff]   ;;  %v2674_v44 = vld [vmem:[#allocation2 + $0x50] ss:$38 sps:$4 sm:$0xff]  }
  0x5a   :  { %2359 = vmatpush3.bf16.msra.mxu0 %v2649_v13  ;;  %v140_v47 = vrot.slane %v2673_v43, %v3069_v36  ;;  %v154_v48 = vrot.slane %v2674_v44, %v3069_v36  ;;  %v2678_v55 = vld [vmem:[#allocation5 + $0x148] sm:$0xff]   ;;  %v2682_v61 = vld [vmem:[#allocation5 + $0x150] sm:$0xff]   ;;  %v2686_v1 = vld [vmem:[#allocation5 + $0x158] sm:$0xff]  }
  0x5b   :  { %2360 = vmatprep.subr.bf16.mxu0 %v2652_v16  ;;  %v156_v45 = vcombine.high %v133_v40, %v147_v41  ;;  %v155_v46 = vcombine.low %v133_v40, %v147_v41  ;;  %v2679_v59 = vld [vmem:[#allocation5 + $0x108] sm:$0xff]   ;;  %v2683_v63 = vld [vmem:[#allocation5 + $0x110] sm:$0xff]   ;;  %v2687_v3 = vld [vmem:[#allocation5 + $0x118] sm:$0xff]  }
  0x5c   :  { %2381 = vmatpush3.bf16.msra.mxu1 %v2651_v15  ;;  %v158_v53 = vcombine.high %v140_v47, %v154_v48  ;;  %v157_v54 = vcombine.low %v140_v47, %v154_v48  ;;  %v2680_v60 = vld [vmem:[#allocation5 + $0x1c8] sm:$0xff]   ;;  %v2684_v0 = vld [vmem:[#allocation5 + $0x1d0] sm:$0xff]   ;;  %v2688_v4 = vld [vmem:[#allocation5 + $0x1d8] sm:$0xff]  }
  0x5d   :  { %2382 = vmatprep.subr.bf16.mxu1 %v2654_v18  ;;  %v322_v50 = vpack.c.bf16 %v156_v45, %v156_v45  ;;  %v321_v51 = vpack.c.bf16 %v155_v46, %v155_v46  ;;  %v2681_v62 = vld [vmem:[#allocation5 + $0x188] sm:$0xff]   ;;  %v2685_v2 = vld [vmem:[#allocation5 + $0x190] sm:$0xff]   ;;  %v2690_v5 = vld [vmem:[#allocation5 + $0x160] sm:$0xff]  }
  0x5e   :  { %2361 = vmatpush3.bf16.msra.mxu0 %v2653_v17  ;;  %v324_v57 = vpack.c.bf16 %v158_v53, %v158_v53  ;;  %v323_v58 = vpack.c.bf16 %v157_v54, %v157_v54  ;;  %v2689_v6 = vld [vmem:[#allocation5 + $0x198] sm:$0xff]   ;;  %v2691_v7 = vld [vmem:[#allocation5 + $0x120] sm:$0xff]   ;;  %v2694_v9 = vld [vmem:[#allocation5 + $0x168] sm:$0xff]  }
  0x5f   :  { %2362 = vmatprep.subr.bf16.mxu0 %v2656_v20  ;;  %1559 = vmatprep.mubr.bf16.mxu0 %v322_v50  ;;  %v2692_v8 = vld [vmem:[#allocation5 + $0x1e0] sm:$0xff]   ;;  %v2695_v11 = vld [vmem:[#allocation5 + $0x128] sm:$0xff]   ;;  %v2698_v13 = vld [vmem:[#allocation5 + $0x170] sm:$0xff]  }
  0x60   :  { %2383 = vmatpush3.bf16.msra.mxu1 %v2655_v19  ;;  %1599 = vmatprep.mubr.bf16.mxu1 %v324_v57  ;;  %v2693_v10 = vld [vmem:[#allocation5 + $0x1a0] sm:$0xff]   ;;  %v2696_v12 = vld [vmem:[#allocation5 + $0x1e8] sm:$0xff]   ;;  %v2699_v15 = vld [vmem:[#allocation5 + $0x130] sm:$0xff]  }
  0x61   :  { %2384 = vmatprep.subr.bf16.mxu1 %v2658_v22  ;;  %v2697_v14 = vld [vmem:[#allocation5 + $0x1a8] sm:$0xff]   ;;  %v2700_v16 = vld [vmem:[#allocation5 + $0x1f0] sm:$0xff]   ;;  %v2702_v18 = vld [vmem:[#allocation5 + $0x178] sm:$0xff]  }
  0x62   :  { %2363 = vmatpush3.bf16.msra.mxu0 %v2657_v21  ;;  %v2701_v17 = vld [vmem:[#allocation5 + $0x1b0] sm:$0xff]   ;;  %v2703_v19 = vld [vmem:[#allocation5 + $0x138] sm:$0xff]   ;;  %v2713_v37 = vld [vmem:[#allocation5 + $0x200] sm:$0xff]  }
  0x63   :  { %2364 = vmatprep.subr.bf16.mxu0 %v2660_v27  ;;  %v2704_v20 = vld [vmem:[#allocation5 + $0x1f8] sm:$0xff]   ;;  %v2716_v40 = vld [vmem:[#allocation5 + $0x248] sm:$0xff]   ;;  %v2715_v41 = vld [vmem:[#allocation5 + $0x280] sm:$0xff]  }
  0x64   :  { %2385 = vmatpush3.bf16.msra.mxu1 %v2659_v26  ;;  %v2705_v21 = vld [vmem:[#allocation2 + $0x8] ss:$38 sps:$4 sm:$0xff]   ;;  %v2707_v22 = vld [vmem:[#allocation2 + $0x54] ss:$38 sps:$4 sm:$0xff]   ;;  %v2717_v44 = vld [vmem:[#allocation5 + $0x208] sm:$0xff]  }
  0x65   :  { %2386 = vmatprep.subr.bf16.mxu1 %v2662_v29  ;;  %v2709_v23 = vld [vmem:[#allocation5 + $0x1b8] sm:$0xff]   ;;  %v169_v24 = vrot.slane %v2705_v21, %v3069_v36  ;;  %v183_v25 = vrot.slane %v2707_v22, %v3069_v36  ;;  %v2710_v26 = vld [vmem:[#allocation5 + $0x240] sm:$0xff]   ;;  %v2718_v45 = vld [vmem:[#allocation5 + $0x2c8] sm:$0xff]  }
  0x66   :  { %2365 = vmatpush3.bf16.msra.mxu0 %v2661_v28  ;;  %v2711_v27 = vld [vmem:[#allocation2 + $0xc] ss:$38 sps:$4 sm:$0xff]   ;;  %v2712_v28 = vld [vmem:[#allocation2 + $0x58] ss:$38 sps:$4 sm:$0xff]  }
  0x67   :  { %2366 = vmatprep.subr.bf16.mxu0 %v2664_v33  ;;  %v192_v29 = vcombine.high %v169_v24, %v183_v25  ;;  %v191_v30 = vcombine.low %v169_v24, %v183_v25  ;;  %v176_v31 = vrot.slane %v2711_v27, %v3069_v36  ;;  %v2714_v33 = vld [vmem:[#allocation5 + $0x2c0] sm:$0xff]   ;;  %v2720_v46 = vld [vmem:[#allocation5 + $0x250] sm:$0xff]   ;;  %v2719_v47 = vld [vmem:[#allocation5 + $0x288] sm:$0xff]  }
  0x68   :  { %2387 = vmatpush3.bf16.msra.mxu1 %v2663_v32  ;;  %v190_v32 = vrot.slane %v2712_v28, %v3069_v36  ;;  %v2721_v48 = vld [vmem:[#allocation5 + $0x210] sm:$0xff]   ;;  %v2724_v50 = vld [vmem:[#allocation5 + $0x258] sm:$0xff]   ;;  %v2728_v54 = vld [vmem:[#allocation5 + $0x260] sm:$0xff]  }
  0x69   :  { %2388 = vmatprep.subr.bf16.mxu1 %v2666_v35  ;;  %v325_v35 = vpack.c.bf16 %v191_v30, %v191_v30  ;;  %v2726_v53 = vld [vmem:[#allocation5 + $0x2d8] sm:$0xff]   ;;  %v2730_v57 = vld [vmem:[#allocation5 + $0x2e0] sm:$0xff]   ;;  %v2754_v25 = vld [vmem:[#allocation5 + $0x348] sm:$0xff]  }
  0x6a   :  { %2367 = vmatpush3.bf16.msra.mxu0 %v2665_v34  ;;  %v326_v34 = vpack.c.bf16 %v192_v29, %v192_v29  ;;  %v194_v38 = vcombine.high %v176_v31, %v190_v32  ;;  %v2753_v24 = vld [vmem:[#allocation5 + $0x380] sm:$0xff]   ;;  %v2755_v28 = vld [vmem:[#allocation5 + $0x308] sm:$0xff]  }
  0x6b   :  { %2396 = vmatprep.subr.bf16.mxu0 %v2672_v42  ;;  %v2756_v29 = vld [vmem:[#allocation5 + $0x3c8] sm:$0xff]  }
  0x6c   :  { %2389 = vmatpush3.bf16.msra.mxu1 %v2671_v39  ;;  %v193_v39 = vcombine.low %v176_v31, %v190_v32  ;;  %v328_v42 = vpack.c.bf16 %v194_v38, %v194_v38  ;;  %v2757_v30 = vld [vmem:[#allocation5 + $0x388] sm:$0xff]   ;;  %v2758_v31 = vld [vmem:[#allocation5 + $0x350] sm:$0xff]   ;;  %v2764_v38 = vld [vmem:[#allocation5 + $0x3d8] sm:$0xff]  }
  0x6d   :  { %2418 = vmatprep.subr.bf16.mxu1 %v2676_v49  ;;  %1560 = vmatmul.mubr.bf16.vlgmr.msra.gmra.mrb[0].mxu0 %v321_v51  ;;  %v2722_v49 = vld [vmem:[#allocation5 + $0x2d0] sm:$0xff]  }
  0x6e   :  { %2397 = vmatpush3.bf16.msra.mxu0 %v2675_v52  ;;  %1639 = vmatprep.mubr.bf16.mxu0 %v326_v34  ;;  %v327_v43 = vpack.c.bf16 %v193_v39, %v193_v39  ;;  %v2723_v51 = vld [vmem:[#allocation5 + $0x290] sm:$0xff]   ;;  %v2725_v52 = vld [vmem:[#allocation5 + $0x218] sm:$0xff]  }
  0x6f   :  { %2398 = vmatprep.subr.bf16.mxu0 %v2678_v55  ;;  %1600 = vmatmul.mubr.bf16.vlgmr.msra.gmra.mrb[0].mxu1 %v323_v58  ;;  %v2727_v55 = vld [vmem:[#allocation5 + $0x298] sm:$0xff]   ;;  %v2732_v58 = vld [vmem:[#allocation5 + $0x268] sm:$0xff]   ;;  %v2759_v32 = vld [vmem:[#allocation5 + $0x310] sm:$0xff]  }
  0x70   :  { %2419 = vmatpush3.bf16.msra.mxu1 %v2677_v56  ;;  %1679 = vmatprep.mubr.bf16.mxu1 %v328_v42  ;;  %v2729_v56 = vld [vmem:[#allocation5 + $0x220] sm:$0xff]   ;;  %v2761_v34 = vld [vmem:[#allocation5 + $0x390] sm:$0xff]   ;;  %v2765_v39 = vld [vmem:[#allocation5 + $0x398] sm:$0xff]  }
  0x71   :  { %2420 = vmatprep.subr.bf16.mxu1 %v2680_v60  ;;  %v2733_v60 = vld [vmem:[#allocation5 + $0x228] sm:$0xff]   ;;  %v2768_v42 = vld [vmem:[#allocation5 + $0x3e0] sm:$0xff]  }
  0x72   :  { %2399 = vmatpush3.bf16.msra.mxu0 %v2679_v59  ;;  %v2731_v59 = vld [vmem:[#allocation5 + $0x2a0] sm:$0xff]  }
  0x73   :  { %2400 = vmatprep.subr.bf16.mxu0 %v2682_v61  ;;  %v2734_v61 = vld [vmem:[#allocation5 + $0x2e8] sm:$0xff]  }
  0x74   :  { %2421 = vmatpush3.bf16.msra.mxu1 %v2681_v62  ;;  %v2736_v62 = vld [vmem:[#allocation5 + $0x270] sm:$0xff]  }
  0x75   :  { %2422 = vmatprep.subr.bf16.mxu1 %v2684_v0  ;;  %v2737_v0 = vld [vmem:[#allocation5 + $0x230] sm:$0xff]  }
  0x76   :  { %2401 = vmatpush3.bf16.msra.mxu0 %v2683_v63  ;;  %v2735_v63 = vld [vmem:[#allocation5 + $0x2a8] sm:$0xff]  }
  0x77   :  { %2402 = vmatprep.subr.bf16.mxu0 %v2686_v1  ;;  %v2738_v1 = vld [vmem:[#allocation5 + $0x2f0] sm:$0xff]  }
  0x78   :  { %2423 = vmatpush3.bf16.msra.mxu1 %v2685_v2  ;;  %v2739_v2 = vld [vmem:[#allocation5 + $0x2b0] sm:$0xff]  }
  0x79   :  { %2424 = vmatprep.subr.bf16.mxu1 %v2688_v4  ;;  %v2741_v4 = vld [vmem:[#allocation5 + $0x238] sm:$0xff]  }
  0x7a   :  { %2403 = vmatpush3.bf16.msra.mxu0 %v2687_v3  ;;  %v2740_v3 = vld [vmem:[#allocation5 + $0x278] sm:$0xff]  }
  0x7b   :  { %2404 = vmatprep.subr.bf16.mxu0 %v2690_v5  ;;  %v2742_v5 = vld [vmem:[#allocation5 + $0x2f8] sm:$0xff]  }
  0x7c   :  { %2425 = vmatpush3.bf16.msra.mxu1 %v2689_v6  ;;  %v2743_v6 = vld [vmem:[#allocation2 + $0x10] ss:$38 sps:$4 sm:$0xff]  }
  0x7d   :  { %2426 = vmatprep.subr.bf16.mxu1 %v2692_v8  ;;  %v205_v8 = vrot.slane %v2743_v6, %v3069_v36 }
  0x7e   :  { %2405 = vmatpush3.bf16.msra.mxu0 %v2691_v7  ;;  %v2745_v7 = vld [vmem:[#allocation2 + $0x5c] ss:$38 sps:$4 sm:$0xff]  }
  0x7f   :  { %2406 = vmatprep.subr.bf16.mxu0 %v2694_v9  ;;  %v2747_v9 = vld [vmem:[#allocation5 + $0x2b8] sm:$0xff]  }
  0x80   :  { %2427 = vmatpush3.bf16.msra.mxu1 %v2693_v10  ;;  %v219_v10 = vrot.slane %v2745_v7, %v3069_v36 }
  0x81   :  { %2428 = vmatprep.subr.bf16.mxu1 %v2696_v12  ;;  %v2749_v12 = vld [vmem:[#allocation2 + $0x14] ss:$38 sps:$4 sm:$0xff]  }
  0x82   :  { %2407 = vmatpush3.bf16.msra.mxu0 %v2695_v11  ;;  %v2748_v11 = vld [vmem:[#allocation5 + $0x340] sm:$0xff]  }
  0x83   :  { %2408 = vmatprep.subr.bf16.mxu0 %v2698_v13  ;;  %v2750_v13 = vld [vmem:[#allocation2 + $0x60] ss:$38 sps:$4 sm:$0xff]  }
  0x84   :  { %2429 = vmatpush3.bf16.msra.mxu1 %v2697_v14  ;;  %v228_v14 = vcombine.high %v205_v8, %v219_v10 }
  0x85   :  { %2430 = vmatprep.subr.bf16.mxu1 %v2700_v16  ;;  %v212_v16 = vrot.slane %v2749_v12, %v3069_v36  ;;  %v2791_v12 = vld [vmem:[#allocation5 + $0x408] sm:$0xff]  }
  0x86   :  { %2409 = vmatpush3.bf16.msra.mxu0 %v2699_v15  ;;  %v227_v15 = vcombine.low %v205_v8, %v219_v10  ;;  %v2790_v8 = vld [vmem:[#allocation5 + $0x448] sm:$0xff]  }
  0x87   :  { %2410 = vmatprep.subr.bf16.mxu0 %v2702_v18  ;;  %v2752_v18 = vld [vmem:[#allocation5 + $0x3c0] sm:$0xff]  }
  0x88   :  { %2431 = vmatpush3.bf16.msra.mxu1 %v2701_v17  ;;  %v226_v17 = vrot.slane %v2750_v13, %v3069_v36  ;;  %v329_v21 = vpack.c.bf16 %v227_v15, %v227_v15  ;;  %v2792_v13 = vld [vmem:[#allocation5 + $0x450] sm:$0xff]   ;;  %v2794_v15 = vld [vmem:[#allocation5 + $0x458] sm:$0xff]  }
  0x89   :  { %2432 = vmatprep.subr.bf16.mxu1 %v2704_v20  ;;  %v330_v20 = vpack.c.bf16 %v228_v14, %v228_v14  ;;  %v2793_v14 = vld [vmem:[#allocation5 + $0x410] sm:$0xff]  }
  0x8a   :  { %2411 = vmatpush3.bf16.msra.mxu0 %v2703_v19  ;;  %v2751_v19 = vld [vmem:[#allocation5 + $0x300] sm:$0xff]   ;;  %v230_v22 = vcombine.high %v212_v16, %v226_v17 }
  0x8b   :  { %2440 = vmatprep.subr.bf16.mxu0 %v2710_v26 }
  0x8c   :  { %2433 = vmatpush3.bf16.msra.mxu1 %v2709_v23  ;;  %v229_v23 = vcombine.low %v212_v16, %v226_v17  ;;  %v332_v26 = vpack.c.bf16 %v230_v22, %v230_v22  ;;  %v2800_v16 = vld [vmem:[#allocation5 + $0x480] sm:$0xff]   ;;  %v2795_v17 = vld [vmem:[#allocation5 + $0x418] sm:$0xff]   ;;  %v2808_v22 = vld [vmem:[#allocation2 + $0x24] ss:$38 sps:$4 sm:$0x33]  }
  0x8d   :  { %2462 = vmatprep.subr.bf16.mxu1 %v2714_v33  ;;  %1640 = vmatmul.mubr.bf16.vlgmr.msra.gmra.mrb[4].mxu0 %v325_v35  ;;  %v2760_v33 = vld [vmem:[#allocation5 + $0x3d0] sm:$0xff]   ;;  %v2762_v35 = vld [vmem:[#allocation5 + $0x358] sm:$0xff]  }
  0x8e   :  { %2441 = vmatpush3.bf16.msra.mxu0 %v2713_v37  ;;  %1719 = vmatprep.mubr.bf16.mxu0 %v330_v20  ;;  %v331_v27 = vpack.c.bf16 %v229_v23, %v229_v23  ;;  %v2763_v37 = vld [vmem:[#allocation5 + $0x318] sm:$0xff]   ;;  %v2797_v20 = vld [vmem:[#allocation5 + $0x420] sm:$0xff]   ;;  %v2812_v23 = vld [vmem:[#allocation5 + $0x490] sm:$0xff]  }
  0x8f   :  { %2442 = vmatprep.subr.bf16.mxu0 %v2716_v40  ;;  %1680 = vmatmul.mubr.bf16.vlgmr.msra.gmra.mrb[4].mxu1 %v327_v43  ;;  %v2766_v40 = vld [vmem:[#allocation5 + $0x360] sm:$0xff]  }
  0x90   :  { %2463 = vmatpush3.bf16.msra.mxu1 %v2715_v41  ;;  %1759 = vmatprep.mubr.bf16.mxu1 %v332_v26  ;;  %v2767_v41 = vld [vmem:[#allocation5 + $0x320] sm:$0xff]   ;;  %v2811_v26 = vld [vmem:[#allocation2 + $0x70] ss:$38 sps:$4 sm:$0x33]  }
  0x91   :  { %2464 = vmatprep.subr.bf16.mxu1 %v2718_v45  ;;  %v2769_v43 = vld [vmem:[#allocation5 + $0x3a0] sm:$0xff]   ;;  %v2771_v45 = vld [vmem:[#allocation5 + $0x328] sm:$0xff]  }
  0x92   :  { %2443 = vmatpush3.bf16.msra.mxu0 %v2717_v44  ;;  %v2770_v44 = vld [vmem:[#allocation5 + $0x368] sm:$0xff]  }
  0x93   :  { %2444 = vmatprep.subr.bf16.mxu0 %v2720_v46  ;;  %v2772_v46 = vld [vmem:[#allocation5 + $0x3e8] sm:$0xff]  }
  0x94   :  { %2465 = vmatpush3.bf16.msra.mxu1 %v2719_v47  ;;  %v2773_v47 = vld [vmem:[#allocation5 + $0x3a8] sm:$0xff]  }
  0x95   :  { %2466 = vmatprep.subr.bf16.mxu1 %v2722_v49  ;;  %v2775_v49 = vld [vmem:[#allocation5 + $0x330] sm:$0xff]  }
  0x96   :  { %2445 = vmatpush3.bf16.msra.mxu0 %v2721_v48  ;;  %v2774_v48 = vld [vmem:[#allocation5 + $0x370] sm:$0xff]  }
  0x97   :  { %2446 = vmatprep.subr.bf16.mxu0 %v2724_v50  ;;  %v2776_v50 = vld [vmem:[#allocation5 + $0x3f0] sm:$0xff]  }
  0x98   :  { %2467 = vmatpush3.bf16.msra.mxu1 %v2723_v51  ;;  %v2777_v51 = vld [vmem:[#allocation5 + $0x3b0] sm:$0xff]  }
  0x99   :  { %2468 = vmatprep.subr.bf16.mxu1 %v2726_v53  ;;  %v2779_v53 = vld [vmem:[#allocation5 + $0x338] sm:$0xff]  }
  0x9a   :  { %2447 = vmatpush3.bf16.msra.mxu0 %v2725_v52  ;;  %v2778_v52 = vld [vmem:[#allocation5 + $0x378] sm:$0xff]  }
  0x9b   :  { %2448 = vmatprep.subr.bf16.mxu0 %v2728_v54  ;;  %v2780_v54 = vld [vmem:[#allocation5 + $0x3f8] sm:$0xff]  }
  0x9c   :  { %2469 = vmatpush3.bf16.msra.mxu1 %v2727_v55  ;;  %v2781_v55 = vld [vmem:[#allocation2 + $0x18] ss:$38 sps:$4 sm:$0xff]  }
  0x9d   :  { %2470 = vmatprep.subr.bf16.mxu1 %v2730_v57  ;;  %v2785_v57 = vld [vmem:[#allocation5 + $0x3b8] sm:$0xff]  }
  0x9e   :  { %2449 = vmatpush3.bf16.msra.mxu0 %v2729_v56  ;;  %v2783_v56 = vld [vmem:[#allocation2 + $0x64] ss:$38 sps:$4 sm:$0xff]  }
  0x9f   :  { %2450 = vmatprep.subr.bf16.mxu0 %v2732_v58  ;;  %v241_v58 = vrot.slane %v2781_v55, %v3069_v36 }
  0xa0   :  { %2471 = vmatpush3.bf16.msra.mxu1 %v2731_v59  ;;  %v255_v59 = vrot.slane %v2783_v56, %v3069_v36 }
  0xa1   :  { %2472 = vmatprep.subr.bf16.mxu1 %v2734_v61  ;;  %v2787_v61 = vld [vmem:[#allocation2 + $0x1c] ss:$38 sps:$4 sm:$0xff]  }
  0xa2   :  { %2451 = vmatpush3.bf16.msra.mxu0 %v2733_v60  ;;  %v2786_v60 = vld [vmem:[#allocation5 + $0x440] sm:$0xff]  }
  0xa3   :  { %2452 = vmatprep.subr.bf16.mxu0 %v2736_v62  ;;  %v2788_v62 = vld [vmem:[#allocation2 + $0x68] ss:$38 sps:$4 sm:$0xff]  }
  0xa4   :  { %2473 = vmatpush3.bf16.msra.mxu1 %v2735_v63  ;;  %v264_v63 = vcombine.high %v241_v58, %v255_v59 }
  0xa5   :  { %2474 = vmatprep.subr.bf16.mxu1 %v2738_v1  ;;  %v248_v1 = vrot.slane %v2787_v61, %v3069_v36  ;;  %v2819_v61 = vld [vmem:[#allocation7 + $0x30] sm:$0xff]  }
  0xa6   :  { %2453 = vmatpush3.bf16.msra.mxu0 %v2737_v0  ;;  %v263_v0 = vcombine.low %v241_v58, %v255_v59 }
  0xa7   :  { %2454 = vmatprep.subr.bf16.mxu0 %v2740_v3  ;;  %v334_v3 = vpack.c.bf16 %v264_v63, %v264_v63  ;;  %v2821_v63 = vld [vmem:[#allocation8] sm:$0xff]  }
  0xa8   :  { %2475 = vmatpush3.bf16.msra.mxu1 %v2739_v2  ;;  %v262_v2 = vrot.slane %v2788_v62, %v3069_v36  ;;  %v2820_v62 = vld [vmem:[#allocation7 + $0x38] sm:$0xff]  }
  0xa9   :  { %2476 = vmatprep.subr.bf16.mxu1 %v2742_v5  ;;  %v2789_v5 = vld [vmem:[#allocation5 + $0x400] sm:$0xff]  }
  0xaa   :  { %2455 = vmatpush3.bf16.msra.mxu0 %v2741_v4  ;;  %v333_v4 = vpack.c.bf16 %v263_v0, %v263_v0  ;;  %v266_v6 = vcombine.high %v248_v1, %v262_v2  ;;  %v265_v7 = vcombine.low %v248_v1, %v262_v2  ;;  %v2822_v0 = vld [vmem:[#allocation8 + $0x8] sm:$0xff]   ;;  %v2823_v1 = vld [vmem:[#allocation8 + $0x10] sm:$0xff]   ;;  %v2824_v2 = vld [vmem:[#allocation8 + $0x18] sm:$0xff]  }
  0xab   :  { %2484 = vmatprep.subr.bf16.mxu0 %v2748_v11 }
  0xac   :  { %2477 = vmatpush3.bf16.msra.mxu1 %v2747_v9  ;;  %v2960_v9 = vmov 0.0   ;;  %v336_v10 = vpack.c.bf16 %v266_v6, %v266_v6  ;;  %v335_v11 = vpack.c.bf16 %v265_v7, %v265_v7 }
  0xad   :  { %2506 = vmatprep.subr.bf16.mxu1 %v2752_v18  ;;  %1720 = vmatmul.mubr.bf16.vlgmr.msra.gmra.mrb[8].mxu0 %v329_v21  ;;  %v2803_v18 = vld [vmem:[#allocation5 + $0x488] sm:$0xff]  }
  0xae   :  { %2485 = vmatpush3.bf16.msra.mxu0 %v2751_v19  ;;  %1799 = vmatprep.mubr.bf16.mxu0 %v334_v3  ;;  %v2796_v19 = vld [vmem:[#allocation5 + $0x460] sm:$0xff]   ;;  %v2806_v21 = vld [vmem:[#allocation2 + $0x20] ss:$38 sps:$4 sm:$0xff]   ;;  %v2825_v3 = vld [vmem:[#allocation8 + $0x20] sm:$0xff]  }
  0xaf   :  { %1760 = vmatmul.mubr.bf16.vlgmr.msra.gmra.mrb[8].mxu1 %v331_v27  ;;  %2486 = vmatprep.subr.bf16.mxu0 %v2754_v25  ;;  %v2809_v25 = vld [vmem:[#allocation2 + $0x6c] ss:$38 sps:$4 sm:$0xff]   ;;  %v2799_v27 = vld [vmem:[#allocation5 + $0x428] sm:$0xff]  }
  0xb0   :  { %2507 = vmatpush3.bf16.msra.mxu1 %v2753_v24  ;;  %1839 = vmatprep.mubr.bf16.mxu1 %v336_v10  ;;  %v2798_v24 = vld [vmem:[#allocation5 + $0x468] sm:$0xff]  }
  0xb1   :  { %2508 = vmatprep.subr.bf16.mxu1 %v2756_v29  ;;  %v284_v29 = vrot.slane %v2808_v22, %v3069_v36 }
  0xb2   :  { %2487 = vmatpush3.bf16.msra.mxu0 %v2755_v28  ;;  %v277_v28 = vrot.slane %v2806_v21, %v3069_v36 }
  0xb3   :  { %2488 = vmatprep.subr.bf16.mxu0 %v2758_v31  ;;  %v291_v31 = vrot.slane %v2809_v25, %v3069_v36 }
  0xb4   :  { %2509 = vmatpush3.bf16.msra.mxu1 %v2757_v30  ;;  %v2801_v30 = vld [vmem:[#allocation5 + $0x470] sm:$0xff]  }
  0xb5   :  { %2510 = vmatprep.subr.bf16.mxu1 %v2760_v33  ;;  %v300_v33 = vcombine.high %v277_v28, %v291_v31 }
  0xb6   :  { %2489 = vmatpush3.bf16.msra.mxu0 %v2759_v32  ;;  %v298_v32 = vrot.slane %v2811_v26, %v3069_v36 }
  0xb7   :  { %2490 = vmatprep.subr.bf16.mxu0 %v2762_v35  ;;  %v2802_v35 = vld [vmem:[#allocation5 + $0x430] sm:$0xff]  }
  0xb8   :  { %2511 = vmatpush3.bf16.msra.mxu1 %v2761_v34  ;;  %v301_v34 = vcombine.low %v284_v29, %v298_v32 }
  0xb9   :  { %2512 = vmatprep.subr.bf16.mxu1 %v2764_v38  ;;  %v338_v38 = vpack.c.bf16 %v300_v33, %v300_v33 }
  0xba   :  { %2491 = vmatpush3.bf16.msra.mxu0 %v2763_v37  ;;  %v2804_v37 = vld [vmem:[#allocation5 + $0x478] sm:$0xff]  }
  0xbb   :  { %2492 = vmatprep.subr.bf16.mxu0 %v2766_v40  ;;  %v2805_v40 = vld [vmem:[#allocation5 + $0x438] sm:$0xff]  }
  0xbc   :  { %2513 = vmatpush3.bf16.msra.mxu1 %v2765_v39  ;;  %v339_v39 = vpack.c.bf16 %v301_v34, %v301_v34 }
  0xbd   :  { %2514 = vmatprep.subr.bf16.mxu1 %v2768_v42  ;;  %v2813_v42 = vld [vmem:[#allocation7] sm:$0xff]  }
  0xbe   :  { %2493 = vmatpush3.bf16.msra.mxu0 %v2767_v41  ;;  %v299_v41 = vcombine.low %v277_v28, %v291_v31 }
  0xbf   :  { %2494 = vmatprep.subr.bf16.mxu0 %v2770_v44  ;;  %v2815_v44 = vld [vmem:[#allocation7 + $0x10] sm:$0xff]  }
  0xc0   :  { %2515 = vmatpush3.bf16.msra.mxu1 %v2769_v43  ;;  %v337_v36 = vpack.c.bf16 %v299_v41, %v299_v41  ;;  %v2814_v43 = vld [vmem:[#allocation7 + $0x8] sm:$0xff]  }
  0xc1   :  { %2516 = vmatprep.subr.bf16.mxu1 %v2772_v46  ;;  %v2817_v46 = vld [vmem:[#allocation7 + $0x20] sm:$0xff]  }
  0xc2   :  { %2495 = vmatpush3.bf16.msra.mxu0 %v2771_v45  ;;  %v2816_v45 = vld [vmem:[#allocation7 + $0x18] sm:$0xff]  }
  0xc3   :  { %2496 = vmatprep.subr.bf16.mxu0 %v2774_v48  ;;  %v2185_v48 = vld [vmem:[%s3143_s2] ss:$0 sm:$0xff] }
  0xc4   :  { %2517 = vmatpush3.bf16.msra.mxu1 %v2773_v47 }
  0xc5   :  { %2518 = vmatprep.subr.bf16.mxu1 %v2776_v50 }
  0xc6   :  { %2497 = vmatpush3.bf16.msra.mxu0 %v2775_v49 }
  0xc7   :  { %2498 = vmatprep.subr.bf16.mxu0 %v2778_v52 }
  0xc8   :  { %2519 = vmatpush3.bf16.msra.mxu1 %v2777_v51 }
  0xc9   :  { %2520 = vmatprep.subr.bf16.mxu1 %v2780_v54 }
  0xca   :  { %2499 = vmatpush3.bf16.msra.mxu0 %v2779_v53 }
  0xcb   :  { %2528 = vmatprep.subr.bf16.mxu0 %v2786_v60  ;;  %v2818_v60 = vld [vmem:[#allocation7 + $0x28] sm:$0xff]  }
  0xcc   :  { %2521 = vmatpush3.bf16.msra.mxu1 %v2785_v57 }
  0xcd   :  { %2572 = vmatprep.subr.bf16.mxu1 %v2960_v9  ;;  %1800 = vmatmul.mubr.bf16.vlgmr.msra.gmra.mrb[12].mxu0 %v333_v4 }
  0xce   :  { %2529 = vmatpush3.bf16.msra.mxu0 %v2789_v5  ;;  %1879 = vmatprep.mubr.bf16.mxu0 %v338_v38 }
  0xcf   :  { %2530 = vmatprep.subr.bf16.mxu0 %v2790_v8  ;;  %1840 = vmatmul.mubr.bf16.vlgmr.msra.gmra.mrb[12].mxu1 %v335_v11  ;;  %v2826_v11 = vld [vmem:[#allocation8 + $0x28] sm:$0xff]  }
  0xd0   :  { %2578 = vmatprep.mubr.msk.bf16.mxu1 %vm2961_vm0, %v2960_v9  ;;  %2573 = vmatpush3.bf16.msra.mxu1 %v2800_v16 }
  0xd1   :  { %2574 = vmatprep.subr.bf16.mxu1 %v2960_v9 }
  0xd2   :  { %2531 = vmatpush3.bf16.msra.mxu0 %v2791_v12 }
  0xd3   :  { %2532 = vmatprep.subr.bf16.mxu0 %v2792_v13 }
  0xd4   :  { %2575 = vmatpush3.bf16.msra.mxu1 %v2803_v18 }
  0xd5   :  { %2576 = vmatprep.subr.bf16.mxu1 %v2960_v9 }
  0xd6   :  { %2533 = vmatpush3.bf16.msra.mxu0 %v2793_v14 }
  0xd7   :  { %2534 = vmatprep.subr.bf16.mxu0 %v2794_v15 }
  0xd8   :  { %2577 = vmatpush3.bf16.msra.mxu1 %v2812_v23 }
  0xd9   :  { %2582 = vmatprep.subr.bf16.mxu1 %v2960_v9 }
  0xda   :  { %2535 = vmatpush3.bf16.msra.mxu0 %v2795_v17 }
  0xdb   :  { %2536 = vmatprep.subr.bf16.mxu0 %v2796_v19  ;;  %2579 = vmatmul.mubr.msk.bf16.vlgmr.msra.gmra.mrb[16].mxu1 %vm1523_vm1, %v339_v39 }
  0xdc   :  { %2598 = vmatprep.mubr.msk.bf16.mxu1 %vm2961_vm0, %v2960_v9  ;;  %2583 = vmatpush3.bf16.msra.mxu1 %v2813_v42 }
  0xdd   :  { %2584 = vmatprep.subr.bf16.mxu1 %v2960_v9 }
  0xde   :  { %2537 = vmatpush3.bf16.msra.mxu0 %v2797_v20 }
  0xdf   :  { %2538 = vmatprep.subr.bf16.mxu0 %v2798_v24 }
  0xe0   :  { %2585 = vmatpush3.bf16.msra.mxu1 %v2814_v43 }
  0xe1   :  { %2586 = vmatprep.subr.bf16.mxu1 %v2960_v9 }
  0xe2   :  { %2539 = vmatpush3.bf16.msra.mxu0 %v2799_v27 }
  0xe3   :  { %2540 = vmatprep.subr.bf16.mxu0 %v2801_v30 }
  0xe4   :  { %2587 = vmatpush3.bf16.msra.mxu1 %v2815_v44 }
  0xe5   :  { %2588 = vmatprep.subr.bf16.mxu1 %v2960_v9 }
  0xe6   :  { %2541 = vmatpush3.bf16.msra.mxu0 %v2802_v35 }
  0xe7   :  { %2542 = vmatprep.subr.bf16.mxu0 %v2804_v37 }
  0xe8   :  { %2589 = vmatpush3.bf16.msra.mxu1 %v2816_v45 }
  0xe9   :  { %2590 = vmatprep.subr.bf16.mxu1 %v2960_v9 }
  0xea   :  { %2543 = vmatpush3.bf16.msra.mxu0 %v2805_v40 }
  0xeb   :  { %2602 = vmatprep.subr.bf16.mxu0 %v2960_v9 }
  0xec   :  { %2591 = vmatpush3.bf16.msra.mxu1 %v2817_v46 }
  0xed   :  { %1880 = vmatmul.mubr.bf16.vlgmr.msra.gmra.mrb[16].mxu0 %v337_v36  ;;  %2592 = vmatprep.subr.bf16.mxu1 %v2960_v9 }
  0xee   :  { %2618 = vmatprep.mubr.msk.bf16.mxu0 %vm2961_vm0, %v2960_v9  ;;  %2603 = vmatpush3.bf16.msra.mxu0 %v2821_v63 }
  0xef   :  { %2604 = vmatprep.subr.bf16.mxu0 %v2960_v9 }
  0xf0   :  { %2593 = vmatpush3.bf16.msra.mxu1 %v2818_v60 }
  0xf1   :  { %2594 = vmatprep.subr.bf16.mxu1 %v2960_v9 }
  0xf2   :  { %2605 = vmatpush3.bf16.msra.mxu0 %v2822_v0 }
  0xf3   :  { %2606 = vmatprep.subr.bf16.mxu0 %v2960_v9 }
  0xf4   :  { %2595 = vmatpush3.bf16.msra.mxu1 %v2819_v61 }
  0xf5   :  { %2596 = vmatprep.subr.bf16.mxu1 %v2960_v9 }
  0xf6   :  { %2607 = vmatpush3.bf16.msra.mxu0 %v2823_v1  ;;  %v2343_v1 = vld [vmem:[%s3147_s6] ss:$0 sm:$0xff] }
  0xf7   :  { %2608 = vmatprep.subr.bf16.mxu0 %v2960_v9 }
  0xf8   :  { %2597 = vmatpush3.bf16.msra.mxu1 %v2820_v62 }
  0xfa   :  { %2609 = vmatpush3.bf16.msra.mxu0 %v2824_v2 }
  0xfb   :  { %2610 = vmatprep.subr.bf16.mxu0 %v2960_v9 }
  0xfe   :  { %2611 = vmatpush3.bf16.msra.mxu0 %v2825_v3 }
  0xff   :  { %2612 = vmatprep.subr.bf16.mxu0 %v2960_v9 }
 0x102   :  { %2613 = vmatpush3.bf16.msra.mxu0 %v2826_v11 }
 0x103   :  { %2614 = vmatprep.subr.bf16.mxu0 %v2960_v9 }
 0x140   :  { %v2368_v47 = vpop.f32.mrb[0].mxu0 }
 0x141   :  { %v2369_v49 = vpop.f32.mrb[1].mxu0 }
 0x142   :  { %v2370_v50 = vadd.f32 %v2369_v49, %v2368_v47  ;;  %v2371_v51 = vpop.f32.mrb[2].mxu0  ;;  %v2390_v52 = vpop.f32.mrb[0].mxu1 }
 0x143   :  { %v2372_v53 = vpop.f32.mrb[3].mxu0  ;;  %v2391_v55 = vpop.f32.mrb[1].mxu1 }
 0x144   :  { %v1562_v54 = vadd.f32 %v2370_v50, %v2185_v48  ;;  %v2392_v56 = vadd.f32 %v2391_v55, %v2390_v52  ;;  %v2393_v57 = vpop.f32.mrb[2].mxu1  ;;  %v2827_v55 = vld [vmem:[#allocation8 + $0x30] sm:$0xff]  }
 0x145   :  { %v2394_v58 = vpop.f32.mrb[3].mxu1  ;;  %2615 = vmatpush3.bf16.msra.mxu0 %v2827_v55  ;;  %v2334_v57 = vld [vmem:[%s3145_s4] ss:$0 sm:$0xff] }
 0x146   :  { %v1602_v59 = vadd.f32 %v2392_v56, %v1562_v54  ;;  %2616 = vmatprep.subr.bf16.mxu0 %v2960_v9  ;;  %v2828_v56 = vld [vmem:[#allocation8 + $0x38] sm:$0xff]  }
 0x149   :  { %2617 = vmatpush3.bf16.msra.mxu0 %v2828_v56 }
 0x160   :  { %v2412_v4 = vpop.f32.mrb[4].mxu0 }
 0x161   :  { %v2413_v5 = vpop.f32.mrb[5].mxu0 }
 0x162   :  { %v2414_v6 = vadd.f32 %v2413_v5, %v2412_v4  ;;  %v2415_v7 = vpop.f32.mrb[6].mxu0  ;;  %v2434_v8 = vpop.f32.mrb[4].mxu1 }
 0x163   :  { %v2416_v10 = vpop.f32.mrb[7].mxu0  ;;  %v2435_v13 = vpop.f32.mrb[5].mxu1 }
 0x164   :  { %v1642_v12 = vadd.f32 %v2414_v6, %v1602_v59  ;;  %v2436_v14 = vadd.f32 %v2435_v13, %v2434_v8  ;;  %v2437_v15 = vpop.f32.mrb[6].mxu1 }
 0x165   :  { %v2438_v16 = vpop.f32.mrb[7].mxu1 }
 0x166   :  { %v1682_v17 = vadd.f32 %v2436_v14, %v1642_v12 }
 0x180   :  { %v2456_v18 = vpop.f32.mrb[8].mxu0 }
 0x181   :  { %v2457_v19 = vpop.f32.mrb[9].mxu0 }
 0x182   :  { %v2458_v20 = vadd.f32 %v2457_v19, %v2456_v18  ;;  %v2459_v21 = vpop.f32.mrb[10].mxu0  ;;  %v2478_v22 = vpop.f32.mrb[8].mxu1 }
 0x183   :  { %v2460_v23 = vpop.f32.mrb[11].mxu0  ;;  %v2479_v24 = vpop.f32.mrb[9].mxu1 }
 0x184   :  { %v1722_v25 = vadd.f32 %v2458_v20, %v1682_v17  ;;  %v2480_v26 = vadd.f32 %v2479_v24, %v2478_v22  ;;  %v2481_v27 = vpop.f32.mrb[10].mxu1 }
 0x185   :  { %v2482_v28 = vpop.f32.mrb[11].mxu1 }
 0x186   :  { %v1762_v29 = vadd.f32 %v2480_v26, %v1722_v25 }
 0x1a0   :  { %v2500_v30 = vpop.f32.mrb[12].mxu0 }
 0x1a1   :  { %v2501_v31 = vpop.f32.mrb[13].mxu0 }
 0x1a2   :  { %v2502_v32 = vadd.f32 %v2501_v31, %v2500_v30  ;;  %v2503_v33 = vpop.f32.mrb[14].mxu0  ;;  %v2522_v34 = vpop.f32.mrb[12].mxu1 }
 0x1a3   :  { %v2504_v35 = vpop.f32.mrb[15].mxu0  ;;  %v2523_v38 = vpop.f32.mrb[13].mxu1 }
 0x1a4   :  { %v1802_v37 = vadd.f32 %v2502_v32, %v1762_v29  ;;  %v2524_v39 = vadd.f32 %v2523_v38, %v2522_v34  ;;  %v2525_v40 = vpop.f32.mrb[14].mxu1 }
 0x1a5   :  { %v2526_v41 = vpop.f32.mrb[15].mxu1 }
 0x1a6   :  { %v1842_v36 = vadd.f32 %v2524_v39, %v1802_v37 }
 0x1ae   :  { %v1921_v42 = vpop.f32.mrb[16].mxu1 }
 0x1af   :  { %v2580_v43 = vpop.f32.mrb[17].mxu1 }
 0x1b0   :  { %v1924_v44 = vpop.f32.mrb[18].mxu1 }
 0x1b1   :  { %v2581_v45 = vpop.f32.mrb[19].mxu1 }
 0x1c0   :  { %v2544_v46 = vpop.f32.mrb[16].mxu0 }
 0x1c1   :  { %v2545_v47 = vpop.f32.mrb[17].mxu0 }
 0x1c2   :  { %v2546_v48 = vadd.f32 %v2545_v47, %v2544_v46  ;;  %v2547_v49 = vpop.f32.mrb[18].mxu0 }
 0x1c3   :  { %v2548_v50 = vpop.f32.mrb[19].mxu0 }
 0x1c4   :  { %v1882_v51 = vadd.f32 %v2546_v48, %v1842_v36 }
 0x1c6   :  { %v1922_v52 = vadd.f32 %v1921_v42, %v1882_v51 }
 0x1c8   :  { %v1927_v53 = vmax.f32 %v1922_v52, 0.0 }
 0x1ca   :  { %v1928_v54 = vpack.c.bf16 %v1927_v53, %v1927_v53 }
 0x1cc   :  { %2599 = vmatmul.mubr.bf16.vlgmr.msra.gmra.mrb[20].mxu1 %v1928_v54 }
 0x29f   :  { %v2034_v58 = vpop.f32.mrb[20].mxu1 }
 0x2a0   :  { %v2035_v59 = vadd.f32 %v2334_v57, %v2034_v58  ;;  %v2600_v60 = vpop.f32.mrb[21].mxu1 }
 0x2a1   :  { %v2037_v61 = vpop.f32.mrb[22].mxu1 }
 0x2a2   :  { %v2040_v62 = vmax.f32 %v2035_v59, 0.0  ;;  %v2601_v63 = vpop.f32.mrb[23].mxu1 }
 0x2a4   :  { %v2041_v0 = vpack.c.bf16 %v2040_v62, %v2040_v62 }
 0x2a6   :  { %2619 = vmatmul.mubr.bf16.vlgmr.msra.gmra.mrb[20].mxu0 %v2041_v0 }
 0x379   :  { %v2147_v2 = vpop.f32.mrb[20].mxu0 }
 0x37a   :  { %v2148_v9 = vadd.f32 %v2343_v1, %v2147_v2  ;;  %v2620_v3 = vpop.f32.mrb[21].mxu0 }
 0x37b   :  { %v2150_v4 = vpop.f32.mrb[22].mxu0 }
 0x37c   :  { %v2621_v5 = vpop.f32.mrb[23].mxu0  ;;  %v2154_v6 = vsel %vm2153_vm2, %v2148_v9, -inf }
 0x37d   :  { %2155 = vmax.xlane.f32.xlu0 %v2154_v6 }
 0x40a   :  { %v2156_v7 = vpop.xlane.xlu0 %2155 }
 0x40b   :  { %v2157_v8 = vsub.f32 %v2148_v9, %v2156_v7 }
 0x40d   :  { %v2158_v10 = vmul.f32 1.442695, %v2157_v8 }
 0x40f   :  { %2829 = vpow2.f32 %v2158_v10 }
 0x419   :  { %v2830_v11 = vpop.eup %2829 }
 0x41a   :  { %v2160_v12 = vsel %vm2153_vm2, %v2830_v11, 0.0 }
 0x41b   :  { %2161 = vadd.xlane.f32.xlu0 %v2160_v12 }
 0x4a8   :  { %v2162_v13 = vpop.xlane.xlu0 %2161 }
 0x4a9   :  { %2831 = vrcp.f32 %v2162_v13 }
 0x4b3   :  { %v2832_v14 = vpop.eup %2831 }
 0x4b4   :  { %v2164_v15 = vmul.f32 %v2832_v14, %v2830_v11 }
 0x4b6   :  { %2165 = vst.msk [vmem:[#allocation10] sm:$0xff] %vm2153_vm2, %v2164_v15 }
 0x4b7   :  { %2170 = vsyncadd [#allocation4], 96  ;;  %s2962_s4 = smov [#allocation10]  }
 0x4b8   :  { %s2171_s6 = sshll.u32 %s2962_s4, 4  ;;  %s2172_s6 = int_to_ptr.vmem [resolvable:$true] %s2171_s6 }
 0x4b9   :  { %s2921_s8 = scalar_lea.vmem %s2172_s6, 32  ;;  %s2925_s9 = scalar_lea.vmem %s2172_s6, 128 }
 0x4ba   :  { %p2922_p4 = scmp.ne.s32.totalorder %s2172_s6, %s2921_s8  ;;  %p2926_p5 = scmp.lt.s32.totalorder %s2172_s6, %s2172_s6 }
 0x4bb   :  { %p2927_p6 = scmp.lt.s32.totalorder %s2925_s9, %s2921_s8 }
 0x4bd   :  { %p2928_p7 = por %p2927_p6, %p2926_p5 }
 0x4bf   :  { %p2929_p8 = pnand %p2928_p7, %p2922_p4 }
 0x4c1   :  { %2932 = shalt.err (!%p2929_p8)
}
 0x4c2   :  { %s2933_s14 = scalar_lea.hbm %s3148_s7, 32 }
 0x4c3   :  { %p2934_p9 = scmp.ne.s32.totalorder %s3148_s7, %s2933_s14  ;;  %p2937_p10 = scmp.lt.u32.totalorder %s2933_s14, %s3148_s7 }
 0x4c5   :  { %p2939_p11 = pnand %p2937_p10, %p2934_p9 }
 0x4c7   :  { %2942 = shalt.err (!%p2939_p11)
}
 0x4c8   :  { %s2963_s0 = smov 32   ;;  %s2964_s16 = smov 2  }
 0x4c9   :  { %2177 = dma.vmem_to_hbm [thread:$0]  %s2172_s6, 32, %s3148_s7, [#allocation4], %s2963_s0, %s2963_s0, %s2964_s16  }
 0x4ca   :  { %2949 = dma.done.wait [#allocation4], 128  }
 0x4cb   :  { %2950 = vsyncadd [#allocation4], 4294967168 }
 0x4cc   :  { %2181 = vsyncpa [#allocation3], 1 }
 0x4cd   :  { %2182 = vsyncpa [#allocation6], 1 }
 0x4ce   :  { %2183 = vsyncpa [#allocation9], 1 }
 0x4cf   :  { %2184 = vsyncpa [#allocation4], 1 }

</bundles_post_ra>
